<compile_context>
chip_gen: v7x
topology: tpu7x:2x2x1
jax: 0.10.0
libtpu: 0.0.40
codegen_flags: <defaults>
</compile_context>

<pallas_src>
import functools

import jax
import jax.numpy as jnp
from jax.experimental import pallas as pl
from jax.experimental.pallas import tpu as pltpu

EPS = 1e-07


def _softplus(v):
    # Numerically-stable softplus == log(1 + exp(v)); matches torch default
    # (beta=1, threshold difference <= exp(-20), negligible).
    return jnp.logaddexp(v, 0.0)


def _evidential_kernel(x_ref, w1_ref, b1_ref, w2_ref, b2_ref, o_ref,
                       *, hidden, chunk, num_chunks, unroll):
    # x_ref:  (1, TB)    batch on the lane axis
    # w1_ref: (H, 1)     b1_ref: (H, 1)
    # w2_ref: (4, H)     b2_ref: (4, 1)
    # o_ref:  (4, TB)

    # ---- loop-invariant, hoisted once (JAX does not CSE broadcast_in_dim) ----
    w1_b = jnp.broadcast_to(w1_ref[...], (hidden, chunk))        # (H, C)
    b1_b = jnp.broadcast_to(b1_ref[...], (hidden, chunk))        # (H, C)
    w2 = w2_ref[...]                                             # (4, H)
    b2_b = jnp.broadcast_to(b2_ref[...], (4, chunk))             # (4, C)

    # Epilogue constants: row 0 = gamma (raw p); rows 1..3 get softplus + const,
    # with the alpha row (row 2) getting the extra +1.
    row = jax.lax.broadcasted_iota(jnp.int32, (4, chunk), 0)
    gamma_mask = row == 0                                        # (4, C)
    add_const = jnp.where(row == 2, 1.0 + EPS, EPS)              # (4, C)

    def body(c, carry):
        off = pl.multiple_of(c * chunk, chunk)
        x_c = x_ref[:, pl.ds(off, chunk)]                        # (1, C)

        # Linear(1, H) + ReLU as a VPU broadcast MAC (K=1 matmul is MXU waste).
        # h_c stays entirely in vregs (no VMEM round-trip).
        h_c = jnp.maximum(w1_b * x_c + b1_b, 0.0)                # (H, C)

        # Linear(H, 4): tiny-M MXU matmul with lane-dense (4, C) output.
        p_c = jnp.dot(w2, h_c, preferred_element_type=jnp.float32) + b2_b

        sp_c = _softplus(p_c)                                    # EUP work
        o_ref[:, pl.ds(off, chunk)] = jnp.where(gamma_mask, p_c, sp_c + add_const)
        return carry

    jax.lax.fori_loop(0, num_chunks, body, 0, unroll=unroll)


def _pick_tile_cols(n):
    """Largest lane-tile that divides n, is a multiple of 128 (or == n for n <= 128),
    keeps >= 2 grid steps once n >= 256 (feeds both v7x TensorCores), capped at
    32768 lanes/step (fused kernel keeps per-step VMEM ~1.3 MiB)."""
    if n <= 128:
        return n
    cap = min(32768, n // 2 if n >= 256 else n)
    c = (cap // 128) * 128
    while c >= 128:
        if n % c == 0:
            return c
        c -= 128
    return n


def evidential_forward(x, w1, b1, w2, b2, *, tile_cols=None, torch_layout=True):
    """x: (N, 1) float32 (PyTorch convention).
    w1: (H, 1), b1: (H, 1), w2: (4, H), b2: (4, 1).
    Returns (N, 4) when torch_layout=True (module semantics); pass
    torch_layout=False to get the lane-dense (4, N) result with no extra
    HBM-bound transpose pass."""
    N = x.shape[0]
    H = w1.shape[0]

    x_t = x.reshape(1, N).astype(jnp.float32)        # batch -> lane axis (free reshape)

    # Pad ragged batches up to a multiple of 128 lanes; sliced back at the end.
    n_pad = N if (N <= 128 or N % 128 == 0) else ((N + 127) // 128) * 128
    if n_pad != N:
        x_t = jnp.pad(x_t, ((0, 0), (0, n_pad - N)))

    if tile_cols is None:
        tile_cols = _pick_tile_cols(n_pad)
    assert n_pad % tile_cols == 0
    assert tile_cols == n_pad or tile_cols % 128 == 0

    # Inner fusion chunk: 128 lanes keeps the (H, chunk) hidden activation plus the
    # hoisted w1/b1 replicas within the vreg budget at H=128.
    chunk = 128 if tile_cols % 128 == 0 else tile_cols
    num_chunks = tile_cols // chunk
    unroll = num_chunks if num_chunks <= 8 else 8    # back-to-back dots hide MRF pops

    kernel = functools.partial(_evidential_kernel, hidden=H, chunk=chunk,
                               num_chunks=num_chunks, unroll=unroll)

    out_t = pl.pallas_call(
        kernel,
        out_shape=jax.ShapeDtypeStruct((4, n_pad), jnp.float32),
        grid_spec=pl.GridSpec(
            grid=(n_pad // tile_cols,),
            in_specs=[
                pl.BlockSpec((1, tile_cols), lambda i: (0, i)),   # x tile (lane-dense)
                pl.BlockSpec((H, 1), lambda i: (0, 0)),           # W1 (full, resident)
                pl.BlockSpec((H, 1), lambda i: (0, 0)),           # b1
                pl.BlockSpec((4, H), lambda i: (0, 0)),           # W2
                pl.BlockSpec((4, 1), lambda i: (0, 0)),           # b2
            ],
            out_specs=pl.BlockSpec((4, tile_cols), lambda i: (0, i)),
        ),
        compiler_params=pltpu.CompilerParams(
            dimension_semantics=("parallel",),        # shards grid steps across TCs (v7x)
        ),
    )(x_t, w1, b1, w2, b2)

    if n_pad != N:
        out_t = out_t[:, :N]
    if torch_layout:
        # Compatibility with the torch module's (N, 4) output. Performance-sensitive
        # callers should take the lane-dense (4, N) result instead.
        return out_t.T
    return out_t


def init_params(key, hidden_dim):
    """Deterministic init matching the module's __init__ shapes (transposed storage).
    kaiming_normal_(fan_in, relu) for weights; torch-default uniform for biases."""
    k1, k2, k3, k4 = jax.random.split(key, 4)

    # Linear(1, hidden): torch weight (hidden, 1) -> stored as (hidden, 1)
    std1 = (2.0 / 1.0) ** 0.5
    w1 = std1 * jax.random.normal(k1, (hidden_dim, 1), dtype=jnp.float32)
    bound1 = 1.0
    b1 = jax.random.uniform(k2, (hidden_dim, 1), dtype=jnp.float32,
                            minval=-bound1, maxval=bound1)

    # Linear(hidden, 4): torch weight (4, hidden) -> stored as (4, hidden)
    std2 = (2.0 / hidden_dim) ** 0.5
    w2 = std2 * jax.random.normal(k3, (4, hidden_dim), dtype=jnp.float32)
    bound2 = 1.0 / (hidden_dim ** 0.5)
    b2 = jax.random.uniform(k4, (4, 1), dtype=jnp.float32,
                            minval=-bound2, maxval=bound2)
    return w1, b1, w2, b2


def reference_forward(x, w1, b1, w2, b2):
    # Pure-JAX reference in the torch (N, feature) convention.
    h = jnp.maximum(x @ w1.T + b1.T, 0.0)            # (N, H)
    p = h @ w2.T + b2.T                              # (N, 4)
    gamma, nu, alpha, beta = p[:, 0:1], p[:, 1:2], p[:, 2:3], p[:, 3:4]
    sp = jax.nn.softplus
    return jnp.concatenate(
        [gamma, sp(nu) + EPS, sp(alpha) + 1.0 + EPS, sp(beta) + EPS], axis=1
    )


if __name__ == "__main__":
    key = jax.random.PRNGKey(0)
    k_x, k_p = jax.random.split(key)

    N = 256           # batch of scalar inputs -> 2 grid steps of 128 lanes
    HIDDEN = 128      # hidden_dim (module default is 100; 128 keeps sublanes aligned)

    x = jax.random.uniform(k_x, (N, 1), dtype=jnp.float32, minval=-4.0, maxval=4.0)
    w1, b1, w2, b2 = init_params(k_p, HIDDEN)
    ref = reference_forward(x, w1, b1, w2, b2)

    # Lane-dense fast path: (4, N), no wrapper transpose.
    out_ld = jax.block_until_ready(
        evidential_forward(x, w1, b1, w2, b2, torch_layout=False))
    # Torch-layout compatibility path: (N, 4), matches the module's output shape.
    out = jax.block_until_ready(evidential_forward(x, w1, b1, w2, b2))

    assert out_ld.shape == (4, N)
    assert out.shape == (N, 4)
    assert jnp.allclose(out_ld, ref.T, atol=1e-5, rtol=1e-5)
    assert jnp.allclose(out, ref, atol=1e-5, rtol=1e-5)

    # Ragged batch (exercises the 128-lane padding path).
    N2 = 200
    x2 = jax.random.uniform(k_x, (N2, 1), dtype=jnp.float32, minval=-4.0, maxval=4.0)
    out2 = jax.block_until_ready(
        evidential_forward(x2, w1, b1, w2, b2, torch_layout=False))
    ref2 = reference_forward(x2, w1, b1, w2, b2)
    assert out2.shape == (4, N2)
    assert jnp.allclose(out2, ref2.T, atol=1e-5, rtol=1e-5)

    print("KERNEL_OK")
</pallas_src>

<mosaic_0001>
module attributes {stable_mosaic.version = 11 : i64} {
  func.func @_evidential_kernel(%arg0: i32, %arg1: memref<1x128xf32, #tpu.memory_space<vmem>>, %arg2: memref<128x1xf32, #tpu.memory_space<vmem>>, %arg3: memref<128x1xf32, #tpu.memory_space<vmem>>, %arg4: memref<4x128xf32, #tpu.memory_space<vmem>>, %arg5: memref<4x1xf32, #tpu.memory_space<vmem>>, %arg6: memref<4x128xf32, #tpu.memory_space<vmem>>) attributes {dimension_semantics = [#tpu.dimension_semantics<parallel>], iteration_bounds = array<i64: 2>, scalar_prefetch = 0 : i64, scratch_operands = 0 : i64, tpu.core_type = #tpu.core_type<tc>, window_params = [{transform_indices = @transform_0, window_bounds = array<i64: 1, 128>}, {pipeline_mode = #tpu.pipeline_mode<synchronous>, transform_indices = @transform_1, window_bounds = array<i64: 128, 1>}, {pipeline_mode = #tpu.pipeline_mode<synchronous>, transform_indices = @transform_2, window_bounds = array<i64: 128, 1>}, {pipeline_mode = #tpu.pipeline_mode<synchronous>, transform_indices = @transform_3, window_bounds = array<i64: 4, 128>}, {pipeline_mode = #tpu.pipeline_mode<synchronous>, transform_indices = @transform_4, window_bounds = array<i64: 4, 1>}, {transform_indices = @transform_5, window_bounds = array<i64: 4, 128>}]} {
    %c0 = arith.constant 0 : index
    %c0_0 = arith.constant 0 : index
    %0 = vector.load %arg2[%c0, %c0_0] : memref<128x1xf32, #tpu.memory_space<vmem>>, vector<128x1xf32>
    %1 = vector.shape_cast %0 : vector<128x1xf32> to vector<128x1xf32>
    %2 = vector.broadcast %1 : vector<128x1xf32> to vector<128x128xf32>
    %c0_1 = arith.constant 0 : index
    %c0_2 = arith.constant 0 : index
    %3 = vector.load %arg3[%c0_1, %c0_2] : memref<128x1xf32, #tpu.memory_space<vmem>>, vector<128x1xf32>
    %4 = vector.shape_cast %3 : vector<128x1xf32> to vector<128x1xf32>
    %5 = vector.broadcast %4 : vector<128x1xf32> to vector<128x128xf32>
    %c0_3 = arith.constant 0 : index
    %c0_4 = arith.constant 0 : index
    %6 = vector.load %arg4[%c0_3, %c0_4] : memref<4x128xf32, #tpu.memory_space<vmem>>, vector<4x128xf32>
    %c0_5 = arith.constant 0 : index
    %c0_6 = arith.constant 0 : index
    %7 = vector.load %arg5[%c0_5, %c0_6] : memref<4x1xf32, #tpu.memory_space<vmem>>, vector<4x1xf32>
    %8 = vector.shape_cast %7 : vector<4x1xf32> to vector<4x1xf32>
    %9 = vector.broadcast %8 : vector<4x1xf32> to vector<4x128xf32>
    %10 = tpu.iota {dimensions = array<i32: 0>} : vector<4x128xi32>
    %c0_i32 = arith.constant 0 : i32
    %11 = vector.broadcast %c0_i32 : i32 to vector<4x128xi32>
    %12 = arith.cmpi eq, %10, %11 : vector<4x128xi32>
    %c2_i32 = arith.constant 2 : i32
    %13 = vector.broadcast %c2_i32 : i32 to vector<4x128xi32>
    %14 = arith.cmpi eq, %10, %13 : vector<4x128xi32>
    %cst = arith.constant 1.00000012 : f32
    %cst_7 = arith.constant 1.000000e-07 : f32
    %15 = vector.broadcast %cst : f32 to vector<4x128xf32>
    %16 = vector.broadcast %cst_7 : f32 to vector<4x128xf32>
    %17 = arith.select %14, %15, %16 : vector<4x128xi1>, vector<4x128xf32>
    %c0_i32_8 = arith.constant 0 : i32
    %c128_i32 = arith.constant 128 : i32
    %18 = arith.muli %c0_i32_8, %c128_i32 : i32
    %19 = tpu.assume_multiple %18, 128 : i32
    %c0_9 = arith.constant 0 : index
    %20 = arith.index_cast %19 : i32 to index
    %21 = vector.load %arg1[%c0_9, %20] : memref<1x128xf32, #tpu.memory_space<vmem>>, vector<1x128xf32>
    %22 = vector.broadcast %21 : vector<1x128xf32> to vector<128x128xf32>
    %23 = arith.mulf %2, %22 : vector<128x128xf32>
    %24 = arith.addf %23, %5 : vector<128x128xf32>
    %cst_10 = arith.constant 0.000000e+00 : f32
    %25 = vector.broadcast %cst_10 : f32 to vector<128x128xf32>
    %26 = arith.maximumf %24, %25 : vector<128x128xf32>
    %cst_11 = arith.constant dense<0.000000e+00> : vector<4x128xf32>
    %27 = tpu.matmul %6, %26, %cst_11 {dimension_numbers = #tpu.dot_dimension_numbers<[1], [0], [0], [1], [0, 0, 1, 1], [], []>} : vector<4x128xf32>, vector<128x128xf32>, vector<4x128xf32> -> vector<4x128xf32>
    %28 = arith.addf %27, %9 : vector<4x128xf32>
    %cst_12 = arith.constant 0.000000e+00 : f32
    %29 = vector.broadcast %cst_12 : f32 to vector<4x128xf32>
    %30 = arith.maximumf %28, %29 : vector<4x128xf32>
    %31 = vector.broadcast %cst_12 : f32 to vector<4x128xf32>
    %32 = arith.subf %28, %31 : vector<4x128xf32>
    %33 = arith.cmpf one, %32, %32 : vector<4x128xf32>
    %34 = vector.broadcast %cst_12 : f32 to vector<4x128xf32>
    %35 = arith.addf %28, %34 : vector<4x128xf32>
    %36 = math.absf %32 : vector<4x128xf32>
    %cst_13 = arith.constant 0.000000e+00 : f32
    %37 = vector.broadcast %cst_13 : f32 to vector<4x128xf32>
    %38 = arith.subf %37, %36 : vector<4x128xf32>
    %39 = math.exp %38 : vector<4x128xf32>
    %40 = math.log1p %39 : vector<4x128xf32>
    %41 = arith.addf %30, %40 : vector<4x128xf32>
    %42 = arith.select %33, %35, %41 : vector<4x128xi1>, vector<4x128xf32>
    %43 = arith.addf %42, %17 : vector<4x128xf32>
    %44 = arith.select %12, %28, %43 : vector<4x128xi1>, vector<4x128xf32>
    %c0_14 = arith.constant 0 : index
    %45 = arith.index_cast %19 : i32 to index
    %46 = vector.load %arg6[%c0_14, %45] : memref<4x128xf32, #tpu.memory_space<vmem>>, vector<4x128xf32>
    tpu.vector_store %arg6[%c0_14, %45], %44 {strides = array<i32>} : memref<4x128xf32, #tpu.memory_space<vmem>>, vector<4x128xf32>,
    %c1_i32 = arith.constant 1 : i32
    return
  }
  func.func @transform_0(%arg0: i32) -> (i32, i32) {
    %c0_i32 = arith.constant 0 : i32
    %c0_i32_0 = arith.constant 0 : i32
    return %c0_i32, %arg0 : i32, i32
  }
  func.func @transform_1(%arg0: i32) -> (i32, i32) {
    %c0_i32 = arith.constant 0 : i32
    %c0_i32_0 = arith.constant 0 : i32
    %c0_i32_1 = arith.constant 0 : i32
    return %c0_i32, %c0_i32_0 : i32, i32
  }
  func.func @transform_2(%arg0: i32) -> (i32, i32) {
    %c0_i32 = arith.constant 0 : i32
    %c0_i32_0 = arith.constant 0 : i32
    %c0_i32_1 = arith.constant 0 : i32
    return %c0_i32, %c0_i32_0 : i32, i32
  }
  func.func @transform_3(%arg0: i32) -> (i32, i32) {
    %c0_i32 = arith.constant 0 : i32
    %c0_i32_0 = arith.constant 0 : i32
    %c0_i32_1 = arith.constant 0 : i32
    return %c0_i32, %c0_i32_0 : i32, i32
  }
  func.func @transform_4(%arg0: i32) -> (i32, i32) {
    %c0_i32 = arith.constant 0 : i32
    %c0_i32_0 = arith.constant 0 : i32
    %c0_i32_1 = arith.constant 0 : i32
    return %c0_i32, %c0_i32_0 : i32, i32
  }
  func.func @transform_5(%arg0: i32) -> (i32, i32) {
    %c0_i32 = arith.constant 0 : i32
    %c0_i32_0 = arith.constant 0 : i32
    return %c0_i32, %arg0 : i32, i32
  }
}

</mosaic_0001>

<bundles_post_ra>
// kernel: tpu_custom_call.1
= control target key start
LH: loop header
LB: loop body
LE: loop exit
PB: predicated region body
PF: predicated region fallthrough
CT: control target
= control target key end

     0   :  { %10 = vsyncpa [#allocation3], 0  ;;  %s1101_s0 = inlined_call_operand.vmem [shape: f32[1,256], index: 0, kind: input, shape index: {}]   ;;  %s1102_s1 = inlined_call_operand.vmem [shape: f32[128,1], index: 1, kind: input, shape index: {}]   ;;  %s1103_s2 = inlined_call_operand.vmem [shape: f32[128,1], index: 2, kind: input, shape index: {}]   ;;  %s1104_s3 = inlined_call_operand.vmem [shape: f32[4,128], index: 3, kind: input, shape index: {}]   ;;  %s1105_s4 = inlined_call_operand.vmem [shape: f32[4,1], index: 4, kind: input, shape index: {}]   ;;  %s1106_s5 = inlined_call_operand.hbm [shape: f32[4,256], index: 5, kind: output, shape index: {}]  }
   0x1   :  { %12 = vsyncpa [#allocation3 + $0x1], 0  ;;  %s873_s18 = smov 0   ;;  %s875_s19 = smov 0  }
   0x2   :  { %s877_s20 = smov 0   ;;  %s879_s21 = smov 0  }
   0x3 LB: > { %s894_s22 = sadd.s32 4294967295, %s835_s21   ;;  %s637_s23 = sadd.s32 4294967294, %s835_s21   ;;  %s835_s21 = sphi %s879_s21, %s1112_s21   ;;  %s831_s20 = sphi %s877_s20, %s1111_s20   ;;  %s827_s19 = sphi %s875_s19, %s1110_s19   ;;  %s823_s18 = sphi %s873_s18, %s1109_s18  }
   0x4   : > { %s898_s24 = sadd.s32 1, %s835_s21   ;;  %s135_s25 = sadd.s32 1, %s831_s20 }
   0x5   : > { %s132_s26 = ssub.s32 %s835_s21, %s898_s24  ;;  %p145_p0 = scmp.ne.s32.totalorder %s831_s20, %s827_s19 }
   0x6   : > { %p133_p1 = scmp.eq.s32.totalorder %s132_s26, 0  ;;  %p146_p2 = scmp.eq.s32.totalorder %s894_s22, 1 }
   0x7   : > { %p151_p3 = scmp.ne.s32.totalorder %s827_s19, %s823_s18  ;;  %p152_p4 = scmp.eq.s32.totalorder %s637_s23, 1 }
   0x8   : > { %s909_s27 = scalar_select %p133_p1, %s831_s20, %s135_s25  }
   0x9   : > { %p911_p5 = por %p146_p2, %p145_p0  ;;  %p915_p6 = por %p152_p4, %p151_p3 }
   0xa   : > { %p640_p7 = scmp.ge.s32.totalorder %s835_s21, 1  ;;  %p188_p8 = scmp.lt.s32.totalorder %s835_s21, 3 }
   0xc   : > { %p189_p9 = pnand %p640_p7, %p188_p8 }
   0xd   : > { %v313_v0 = vld [vmem:[%s1103_s2] sm:$0xff] (!%p189_p9)  ;;  %v837_v2 = vmov (!%p189_p9), 0   ;;  %v314_v3 = vld [vmem:[%s1103_s2 + $0x8] sm:$0xff] (!%p189_p9)  ;;  %v220_v5 = vld [vmem:[%s1102_s1 + $0x18] sm:$0xff] (!%p189_p9)  ;;  %v838_v9 = vmov (!%p189_p9), 0.0|0.0   ;;  %vm839_vm0 = vmmov (!%p189_p9), 0  }
   0xe   : > { %192 = sbr.rel (%p189_p9) target bundleno = 479 (0x1df), region = 40  ;;  %v217_v1 = vld [vmem:[%s1102_s1] sm:$0xff] (!%p189_p9)  ;;  %768 = vset.pattern.permute.xlu1 (!%p189_p9), %v837_v2  ;;  %767 = vset.pattern.permute.xlu0 (!%p189_p9), %v837_v2  ;;  %v218_v4 = vld [vmem:[%s1102_s1 + $0x8] sm:$0xff] (!%p189_p9)  ;;  %v219_v6 = vld [vmem:[%s1102_s1 + $0x10] sm:$0xff] (!%p189_p9)  ;;  %v840_v35 = vmov (!%p189_p9), 0.0   ;;  %p214_p10 = scmp.lt.s32.totalorder (!%p189_p9), %s894_s22, 1 }
   0xf   : > { %331 = vperm.xlu1 (!%p189_p9), %768, %v313_v0   ;;  %235 = vperm.xlu0 (!%p189_p9), %767, %v217_v1   ;;  %v316_v7 = vld [vmem:[%s1103_s2 + $0x18] sm:$0xff] (!%p189_p9)  ;;  %v315_v8 = vld [vmem:[%s1103_s2 + $0x10] sm:$0xff] (!%p189_p9)  ;;  %v222_v10 = vld [vmem:[%s1102_s1 + $0x28] sm:$0xff] (!%p189_p9)  ;;  %s211_s13 = sand.u32 (!%p189_p9), 1, %s827_s19   ;;  %s644_s15 = sshll.u32 (!%p189_p9), %s894_s22, 6 }
  0x10   : > { %699 = vmatprep.subr.bf16.mxu0 (!%p189_p9), %v838_v9  ;;  %v221_v11 = vld [vmem:[%s1102_s1 + $0x20] sm:$0xff] (!%p189_p9)  ;;  %v318_v12 = vld [vmem:[%s1103_s2 + $0x28] sm:$0xff] (!%p189_p9)  ;;  %v224_v14 = vld [vmem:[%s1102_s1 + $0x38] sm:$0xff] (!%p189_p9)  ;;  %696 = vmatprep.mubr.msk.f32.mxu0 (!%p189_p9), %vm839_vm0, %v840_v35  ;;  %s641_s14 = sshll.u32 (!%p189_p9), %s211_s13, 2  ;;  %s1059_s26 = scalar_lea.hbm (!%p189_p9), %s1106_s5, %s644_s15 }
  0x11   : > { %v317_v13 = vld [vmem:[%s1103_s2 + $0x20] sm:$0xff] (!%p189_p9)  ;;  %v223_v15 = vld [vmem:[%s1102_s1 + $0x30] sm:$0xff] (!%p189_p9)  ;;  %v320_v16 = vld [vmem:[%s1103_s2 + $0x38] sm:$0xff] (!%p189_p9)  ;;  %s213_s16 = scalar_lea.vmem (!%p189_p9), [#allocation2], %s641_s14  ;;  %s568_s30 = scalar_lea.sflag (!%p189_p9), [#allocation3], %s211_s13 }
  0x12   : > { %v319_v17 = vld [vmem:[%s1103_s2 + $0x30] sm:$0xff] (!%p189_p9)  ;;  %v226_v18 = vld [vmem:[%s1102_s1 + $0x48] sm:$0xff] (!%p189_p9)  ;;  %v225_v19 = vld [vmem:[%s1102_s1 + $0x40] sm:$0xff] (!%p189_p9)  ;;  %s581_s17 = sshll.u32 (!%p189_p9), %s213_s16, 4  ;;  %s1061_s17 = int_to_ptr.vmem [resolvable:$true] %s581_s17 }
  0x13   : > { %336 = vperm.xlu1 (!%p189_p9), %768, %v314_v3   ;;  %240 = vperm.xlu0 (!%p189_p9), %767, %v218_v4   ;;  %v322_v20 = vld [vmem:[%s1103_s2 + $0x48] sm:$0xff] (!%p189_p9)  ;;  %v321_v21 = vld [vmem:[%s1103_s2 + $0x40] sm:$0xff] (!%p189_p9)  ;;  %v228_v22 = vld [vmem:[%s1102_s1 + $0x58] sm:$0xff] (!%p189_p9)  ;;  %s773_s6 = scalar_lea.vmem (!%p189_p9), %s1061_s17, 64 }
  0x14   : > { %v227_v23 = vld [vmem:[%s1102_s1 + $0x50] sm:$0xff] (!%p189_p9)  ;;  %v324_v24 = vld [vmem:[%s1103_s2 + $0x58] sm:$0xff] (!%p189_p9)  ;;  %v230_v26 = vld [vmem:[%s1102_s1 + $0x68] sm:$0xff] (!%p189_p9)  ;;  %p774_p11 = scmp.ne.s32.totalorder (!%p189_p9), %s1061_s17, %s773_s6 }
  0x15   : > { %v323_v25 = vld [vmem:[%s1103_s2 + $0x50] sm:$0xff]  ;;  %v229_v27 = vld [vmem:[%s1102_s1 + $0x60] sm:$0xff]  ;;  %v326_v28 = vld [vmem:[%s1103_s2 + $0x68] sm:$0xff]  ;;  %s215_s7 = scalar_select %p214_p10, %s894_s22, 1 }
  0x16   : > { %v325_v29 = vld [vmem:[%s1103_s2 + $0x60] sm:$0xff]  ;;  %v232_v30 = vld [vmem:[%s1102_s1 + $0x78] sm:$0xff]  ;;  %v231_v31 = vld [vmem:[%s1102_s1 + $0x70] sm:$0xff]  ;;  %p775_p12 = pnand %p774_p11, %p911_p5  ;;  %s842_s22 = smov [#allocation2]  }
  0x17   : > { %250 = vperm.xlu1 %768, %v220_v5   ;;  %245 = vperm.xlu0 %767, %v219_v6   ;;  %v328_v32 = vld [vmem:[%s1103_s2 + $0x78] sm:$0xff]  ;;  %v327_v33 = vld [vmem:[%s1103_s2 + $0x70] sm:$0xff]  ;;  %v410_v34 = vld [vmem:[%s1105_s4] sm:$0xf]  ;;  %s216_s10 = scalar_lea.vmem %s1101_s0, %s215_s7  ;;  %s777_s7 = sshll.u32 %s842_s22, 4  ;;  %s778_s7 = int_to_ptr.vmem [resolvable:$false] %s777_s7 }
  0x18   : > { %v1026_v36 = vld [vmem:[%s216_s10] ss:$0 sm:$0xff]  ;;  %p776_p13 = pneg %p775_p12  ;;  %s779_s8 = scalar_lea.vmem %s778_s7, 128 }
  0x19   : > { %p780_p0 = scmp.lt.s32.totalorder %s1061_s17, %s778_s7  ;;  %p781_p1 = scmp.lt.s32.totalorder %s779_s8, %s773_s6 }
  0x1b   : > { %346 = vperm.xlu1 %768, %v316_v7   ;;  %341 = vperm.xlu0 %767, %v315_v8   ;;  %p782_p2 = por %p781_p1, %p780_p0 }
  0x1d   : > { %p783_p3 = pnand %p782_p2, %p776_p13 }
  0x1f   : > { %260 = vperm.xlu1 %768, %v222_v10   ;;  %255 = vperm.xlu0 %767, %v221_v11  }
  0x23   : > { %356 = vperm.xlu1 %768, %v318_v12   ;;  %351 = vperm.xlu0 %767, %v317_v13  }
  0x27   : > { %270 = vperm.xlu1 %768, %v224_v14   ;;  %265 = vperm.xlu0 %767, %v223_v15  }
  0x2b   : > { %366 = vperm.xlu1 %768, %v320_v16   ;;  %361 = vperm.xlu0 %767, %v319_v17  }
  0x2f   : > { %280 = vperm.xlu1 %768, %v226_v18   ;;  %275 = vperm.xlu0 %767, %v225_v19  }
  0x33   : > { %376 = vperm.xlu1 %768, %v322_v20   ;;  %371 = vperm.xlu0 %767, %v321_v21  }
  0x37   : > { %290 = vperm.xlu1 %768, %v228_v22   ;;  %285 = vperm.xlu0 %767, %v227_v23  }
  0x3b   : > { %386 = vperm.xlu1 %768, %v324_v24   ;;  %381 = vperm.xlu0 %767, %v323_v25  }
  0x3f   : > { %300 = vperm.xlu1 %768, %v230_v26   ;;  %295 = vperm.xlu0 %767, %v229_v27  }
  0x43   : > { %396 = vperm.xlu1 %768, %v326_v28   ;;  %391 = vperm.xlu0 %767, %v325_v29  }
  0x47   : > { %310 = vperm.xlu1 %768, %v232_v30   ;;  %305 = vperm.xlu0 %767, %v231_v31  }
  0x4b   : > { %406 = vperm.xlu1 %768, %v328_v32   ;;  %401 = vperm.xlu0 %767, %v327_v33  }
  0x4f   : > { %413 = vperm.xlu0 %767, %v410_v34  }
  0x8e   : > { %v332_v37 = vpop.permute.xlu1 %331  ;;  %v236_v38 = vpop.permute.xlu0 %235 }
  0x8f   : > { %v428_v39 = vmul.f32 %v1026_v36, %v236_v38 }
  0x91   : > { %v444_v42 = vadd.f32 %v428_v39, %v332_v37 }
  0x92   : > { %v337_v40 = vpop.permute.xlu1 %336  ;;  %v241_v41 = vpop.permute.xlu0 %240 }
  0x93   : > { %v429_v43 = vmul.f32 %v1026_v36, %v241_v41  ;;  %v460_v47 = vmax.f32 %v444_v42, 0.0 }
  0x95   : > { %v445_v44 = vadd.f32 %v429_v43, %v337_v40 }
  0x96   : > { %v251_v45 = vpop.permute.xlu1 %250  ;;  %v246_v46 = vpop.permute.xlu0 %245 }
  0x97   : > { %v461_v48 = vmax.f32 %v445_v44, 0.0  ;;  %v431_v49 = vmul.f32 %v1026_v36, %v251_v45  ;;  %v430_v50 = vmul.f32 %v1026_v36, %v246_v46 }
  0x99   : > { %v700_v51 = vpack.c.bf16 %v461_v48, %v460_v47 }
  0x9a   : > { %v347_v52 = vpop.permute.xlu1 %346  ;;  %v342_v53 = vpop.permute.xlu0 %341 }
  0x9b   : > { %v447_v54 = vadd.f32 %v431_v49, %v347_v52  ;;  %v446_v55 = vadd.f32 %v430_v50, %v342_v53  ;;  %701 = vmatpush3.bf16.msra.mxu0 %v700_v51 }
  0x9c   : > { %702 = vmatprep.subr.bf16.mxu0 %v838_v9 }
  0x9d   : > { %v463_v56 = vmax.f32 %v447_v54, 0.0  ;;  %v462_v57 = vmax.f32 %v446_v55, 0.0 }
  0x9e   : > { %v261_v58 = vpop.permute.xlu1 %260  ;;  %v256_v59 = vpop.permute.xlu0 %255 }
  0x9f   : > { %v703_v60 = vpack.c.bf16 %v463_v56, %v462_v57  ;;  %v433_v61 = vmul.f32 %v1026_v36, %v261_v58  ;;  %v432_v62 = vmul.f32 %v1026_v36, %v256_v59 }
  0xa1   : > { %704 = vmatpush3.bf16.msra.mxu0 %v703_v60 }
  0xa2   : > { %v357_v63 = vpop.permute.xlu1 %356  ;;  %v352_v0 = vpop.permute.xlu0 %351  ;;  %705 = vmatprep.subr.bf16.mxu0 %v838_v9 }
  0xa3   : > { %v449_v1 = vadd.f32 %v433_v61, %v357_v63  ;;  %v448_v2 = vadd.f32 %v432_v62, %v352_v0  ;;  %v409_v63 = vld [vmem:[%s1104_s3] sm:$0xf] }
  0xa5   : > { %v465_v3 = vmax.f32 %v449_v1, 0.0  ;;  %v464_v4 = vmax.f32 %v448_v2, 0.0 }
  0xa6   : > { %v271_v5 = vpop.permute.xlu1 %270  ;;  %v266_v6 = vpop.permute.xlu0 %265 }
  0xa7   : > { %v706_v7 = vpack.c.bf16 %v465_v3, %v464_v4  ;;  %v435_v8 = vmul.f32 %v1026_v36, %v271_v5  ;;  %v434_v10 = vmul.f32 %v1026_v36, %v266_v6 }
  0xa9   : > { %707 = vmatpush3.bf16.msra.mxu0 %v706_v7  ;;  %v416_v7 = vlaneseq }
  0xaa   : > { %v367_v11 = vpop.permute.xlu1 %366  ;;  %v362_v12 = vpop.permute.xlu0 %361  ;;  %708 = vmatprep.subr.bf16.mxu0 %v838_v9 }
  0xab   : > { %v451_v13 = vadd.f32 %v435_v8, %v367_v11  ;;  %v450_v14 = vadd.f32 %v434_v10, %v362_v12  ;;  %v417_v10 = vshrl.u32 %v416_v7, 7 }
  0xad   : > { %v467_v15 = vmax.f32 %v451_v13, 0.0  ;;  %v466_v16 = vmax.f32 %v450_v14, 0.0  ;;  %vm419_vm1 = vcmp.eq.s32.totalorder %v417_v10, 2  ;;  %vm418_vm4 = vcmp.eq.s32.totalorder %v417_v10, 0 }
  0xae   : > { %v281_v17 = vpop.permute.xlu1 %280  ;;  %v276_v18 = vpop.permute.xlu0 %275 }
  0xaf   : > { %v709_v19 = vpack.c.bf16 %v467_v15, %v466_v16  ;;  %v437_v20 = vmul.f32 %v1026_v36, %v281_v17  ;;  %v436_v21 = vmul.f32 %v1026_v36, %v276_v18  ;;  %v841_v18 = vmov 1e-07  }
  0xb1   : > { %710 = vmatpush3.bf16.msra.mxu0 %v709_v19  ;;  %v420_v19 = vsel %vm419_vm1, 1.0000001, %v841_v18 }
  0xb2   : > { %v377_v22 = vpop.permute.xlu1 %376  ;;  %v372_v23 = vpop.permute.xlu0 %371  ;;  %711 = vmatprep.subr.bf16.mxu0 %v838_v9 }
  0xb3   : > { %v453_v24 = vadd.f32 %v437_v20, %v377_v22  ;;  %v452_v25 = vadd.f32 %v436_v21, %v372_v23 }
  0xb5   : > { %v469_v26 = vmax.f32 %v453_v24, 0.0  ;;  %v468_v27 = vmax.f32 %v452_v25, 0.0 }
  0xb6   : > { %v291_v28 = vpop.permute.xlu1 %290  ;;  %v286_v29 = vpop.permute.xlu0 %285 }
  0xb7   : > { %v712_v30 = vpack.c.bf16 %v469_v26, %v468_v27  ;;  %v439_v31 = vmul.f32 %v1026_v36, %v291_v28  ;;  %v438_v32 = vmul.f32 %v1026_v36, %v286_v29 }
  0xb9   : > { %713 = vmatpush3.bf16.msra.mxu0 %v712_v30 }
  0xba   : > { %v387_v33 = vpop.permute.xlu1 %386  ;;  %v382_v34 = vpop.permute.xlu0 %381  ;;  %714 = vmatprep.subr.bf16.mxu0 %v838_v9 }
  0xbb   : > { %v455_v35 = vadd.f32 %v439_v31, %v387_v33  ;;  %v454_v37 = vadd.f32 %v438_v32, %v382_v34 }
  0xbd   : > { %v471_v38 = vmax.f32 %v455_v35, 0.0  ;;  %v470_v39 = vmax.f32 %v454_v37, 0.0 }
  0xbe   : > { %v301_v40 = vpop.permute.xlu1 %300  ;;  %v296_v41 = vpop.permute.xlu0 %295 }
  0xbf   : > { %v715_v42 = vpack.c.bf16 %v471_v38, %v470_v39  ;;  %v441_v43 = vmul.f32 %v1026_v36, %v301_v40  ;;  %v440_v44 = vmul.f32 %v1026_v36, %v296_v41 }
  0xc1   : > { %716 = vmatpush3.bf16.msra.mxu0 %v715_v42 }
  0xc2   : > { %v397_v45 = vpop.permute.xlu1 %396  ;;  %v392_v46 = vpop.permute.xlu0 %391  ;;  %717 = vmatprep.subr.bf16.mxu0 %v838_v9 }
  0xc3   : > { %v457_v47 = vadd.f32 %v441_v43, %v397_v45  ;;  %v456_v48 = vadd.f32 %v440_v44, %v392_v46 }
  0xc5   : > { %v473_v49 = vmax.f32 %v457_v47, 0.0  ;;  %v472_v50 = vmax.f32 %v456_v48, 0.0 }
  0xc6   : > { %v311_v51 = vpop.permute.xlu1 %310  ;;  %v306_v52 = vpop.permute.xlu0 %305 }
  0xc7   : > { %v718_v53 = vpack.c.bf16 %v473_v49, %v472_v50  ;;  %v443_v54 = vmul.f32 %v1026_v36, %v311_v51  ;;  %v442_v55 = vmul.f32 %v1026_v36, %v306_v52 }
  0xc9   : > { %719 = vmatpush3.bf16.msra.mxu0 %v718_v53 }
  0xca   : > { %v407_v56 = vpop.permute.xlu1 %406  ;;  %v402_v57 = vpop.permute.xlu0 %401  ;;  %720 = vmatprep.subr.bf16.mxu0 %v838_v9 }
  0xcb   : > { %v459_v58 = vadd.f32 %v443_v54, %v407_v56  ;;  %v458_v59 = vadd.f32 %v442_v55, %v402_v57 }
  0xcd   : > { %v475_v60 = vmax.f32 %v459_v58, 0.0  ;;  %v474_v61 = vmax.f32 %v458_v59, 0.0 }
  0xce   : > { %v414_v0 = vpop.permute.xlu0 %413 }
  0xcf   : > { %v721_v62 = vpack.c.bf16 %v475_v60, %v474_v61 }
  0xd1   : > { %722 = vmatpush3.bf16.msra.mxu0 %v721_v62 }
  0xd4   : > { %697 = vmatmul.mubr.f32.vlgmr.msra.gmra.mrb[0].mxu0 %v409_v63 }
 0x1a7   : > { %v542_v1 = vpop.f32.mrb[0].mxu0 }
 0x1a8   : > { %v543_v36 = vadd.f32 %v542_v1, %v414_v0  ;;  %v698_v2 = vpop.f32.mrb[1].mxu0 }
 0x1aa   : > { %v549_v3 = vand.u32 2147483647, %v543_v36  ;;  %v546_v16 = vmax.f32 %v543_v36, 0.0  ;;  %vm547_vm3 = vcmp.ne.f32.partialorder %v543_v36, %v543_v36 }
 0x1ac   : > { %v550_v4 = vsub.f32 0.0, %v549_v3 }
 0x1ae   : > { %v551_v5 = vmul.f32 1.442695, %v550_v4 }
 0x1b0   : > { %769 = vpow2.f32 %v551_v5 }
 0x1ba   : > { %v770_v9 = vpop.eup %769 }
 0x1bb   : > { %v553_v6 = vadd.f32 1.0, %v770_v9  ;;  %v556_v8 = vmul.f32 -0.5, %v770_v9  ;;  %v559_v12 = vand.u32 2147483647, %v770_v9 }
 0x1bd   : > { %771 = vlog2.f32 %v553_v6  ;;  %v557_v11 = vadd.f32 1.0, %v556_v8  ;;  %vm560_vm2 = vcmp.lt.f32.partialorder %v559_v12, 0.0004427343 }
 0x1bf   : > { %v558_v15 = vmul.f32 %v770_v9, %v557_v11 }
 0x1c7   : > { %v772_v13 = vpop.eup %771 }
 0x1c8   : > { %v555_v14 = vmul.f32 0.6931472, %v772_v13 }
 0x1ca   : > { %v561_v17 = vsel %vm560_vm2, %v558_v15, %v555_v14 }
 0x1cb   : > { %v562_v20 = vadd.f32 %v561_v17, %v546_v16 }
 0x1cd   : > { %v563_v21 = vsel %vm547_vm3, %v543_v36, %v562_v20 }
 0x1ce   : > { %v564_v22 = vadd.f32 %v563_v21, %v420_v19 }
 0x1d0   : > { %v565_v23 = vsel %vm418_vm4, %v543_v36, %v564_v22 }
 0x1d1   : > { %566 = vst [vmem:[%s213_s16] sm:$0xf] %v565_v23 }
 0x1d2   : > { %786 = shalt.err (!%p783_p3)
}
 0x1d3   : > { %s787_s9 = scalar_lea.hbm %s1059_s26, 64  ;;  %s791_s12 = scalar_lea.hbm %s1106_s5, 128 }
 0x1d4   : > { %p788_p4 = scmp.ne.s32.totalorder %s1059_s26, %s787_s9  ;;  %p792_p9 = scmp.lt.u32.totalorder %s1059_s26, %s1106_s5 }
 0x1d5   : > { %p793_p10 = scmp.lt.u32.totalorder %s791_s12, %s787_s9  ;;  %p795_p12 = scmp.lt.u32.totalorder %s787_s9, %s1059_s26 }
 0x1d6   : > { %p789_p7 = pnand %p788_p4, %p911_p5 }
 0x1d7   : > { %p794_p11 = por %p793_p10, %p792_p9 }
 0x1d8   : > { %p790_p8 = pneg %p789_p7 }
 0x1d9   : > { %p796_p13 = por %p795_p12, %p794_p11 }
 0x1db   : > { %p797_p0 = pnand %p796_p13, %p790_p8 }
 0x1dd   : > { %800 = shalt.err (!%p797_p0)
}
 0x1de   : > { %723 = dma.vmem_to_hbm [thread:$0]  (%p911_p5), %s1061_s17, 64, %s1059_s26, %s568_s30  }
 0x1df PF: > { %p729_p1 = scmp.ge.s32.totalorder %s835_s21, 2  ;;  %s593_s15 = sand.u32 1, %s823_s18  }
 0x1e0   : > { %s594_s16 = scalar_lea.sflag [#allocation3], %s593_s15 }
 0x1e1   : > { %p726_p2 = pnand %p729_p1, %p915_p6 }
 0x1e3   : > { %818 = dma.done.wait (!%p726_p2), %s594_s16, 64  }
 0x1e4   : > { %820 = vsyncadd (!%p726_p2), %s594_s16, 4294967232  ;;  %p15_p3 = scmp.ge.s32.totalorder %s898_s24, 4   ;;  %s1109_s18 = smov %s827_s19 }
 0x1e5   : > { %s1110_s19 = smov %s831_s20  ;;  %s1111_s20 = smov %s909_s27 }
 0x1e6   : > { %s1112_s21 = smov %s898_s24  ;;  %17 = sbr.rel (!%p15_p3) target bundleno = 3 (0x3), region = 75 }
 0x1ed   :  { %599 = vsyncpa [#allocation3], 1 }
 0x1ee   :  { %601 = vsyncpa [#allocation3 + $0x1], 1 }

</bundles_post_ra>
